<compile_context>
chip_gen: v7x
topology: tpu7x:2x2x1
jax: 0.10.0
libtpu: 0.0.40
codegen_flags: <defaults>
</compile_context>

<pallas_src>
import numpy as np
import jax
import jax.numpy as jnp
from jax.experimental import pallas as pl
from jax.experimental.pallas import tpu as pltpu

NUM_CHANNELS = [16, 32, 64]
KERNEL_SIZE = 2  # kernel below is specialized to kernel_size == 2 (module default)

# Tile-selection budget (all chips): keep worst-case live footprint well under
# v7x's 64 MiB physical / 32 MiB default-scoped VMEM and v5e's 16 MiB default.
_MAX_TILE_LANES = 4096            # ~1-8K lane target from the perf review
_BYTES_PER_LANE_EST = 3 * 1024    # conservative live-footprint estimate / lane


def _round_up(n, m):
    return ((n + m - 1) // m) * m


# ----------------------------- Pallas kernel ------------------------------ #
def make_tcn_kernel(layer_meta, seq_len):
    """Build the fused 3-block TCN kernel.

    layer_meta : static tuple of (c_out, dilation) per TemporalBlock.
    seq_len    : static per-batch-element sequence length T.

    Per grid step (one batch tile flattened to (C, L), L = bt*T lanes):
      x_ref                               : (Cin_pad, L)     f32
      per layer: w_cur (2*Cout, Cin)  bf16  rows = [conv1 tap@t ; 1x1 residual]
                 w_del (Cout,  Cin)   bf16  conv1 tap@t-d
                 b_cur (2*Cout, 1)    f32   [b1 ; b_res]
                 w2_cur / w2_del (Cout, Cout) bf16  conv2 taps
                 b2    (Cout, 1)      f32
      o_ref                               : (Cout_last, L)   f32
    """

    def kernel(x_ref, *args):
        o_ref = args[-1]
        w_refs = args[:-1]
        L = x_ref.shape[-1]

        # Causal masks from an in-kernel iota: lane l holds local time
        # t = l % seq_len of one batch element (lanes are T-contiguous per
        # batch element, starting at lane 0 -- invariant asserted in the
        # wrapper).  mask_d[l] = 0 where t < d, so the lane roll below can
        # never leak across batch elements, tile edges, or pad lanes.
        t_loc = jax.lax.broadcasted_iota(jnp.int32, (1, L), 1) % seq_len
        masks = {d: (t_loc >= d).astype(jnp.float32)
                 for d in sorted({d for _, d in layer_meta})}

        def delayed_bf16(v_f32, d):
            # v[:, t] -> v[:, t-d], zero-filled, cast to bf16 for the MXU.
            # Roll runs on the XLU slot; the mask multiply stays f32 on the
            # VPU (v5e has no bf16 VPU).
            return (pltpu.roll(v_f32, shift=d, axis=1)
                    * masks[d]).astype(jnp.bfloat16)

        h = x_ref[...]                                   # (Cin_pad, L) f32
        wi = 0
        for c_out, d in layer_meta:
            w_cur = w_refs[wi][...]
            w_del = w_refs[wi + 1][...]
            b_cur = w_refs[wi + 2][...]
            w2_cur = w_refs[wi + 3][...]
            w2_del = w_refs[wi + 4][...]
            b2 = w_refs[wi + 5][...]
            wi += 6

            hb = h.astype(jnp.bfloat16)

            # conv1 tap@t fused (by host-side row packing) with the 1x1
            # residual conv; tap@t-d accumulated with a second dot — no
            # (2C, L) activation concat temporaries.
            cur = jnp.dot(w_cur, hb,
                          preferred_element_type=jnp.float32) + b_cur
            dly = jnp.dot(w_del, delayed_bf16(h, d),
                          preferred_element_type=jnp.float32)
            h1 = jnp.maximum(cur[:c_out] + dly, 0.0)     # relu(conv1)
            res = cur[c_out:]                            # net(x) residual

            # conv2 (dilated, causal) + ReLU: two accumulating dots.
            h1b = h1.astype(jnp.bfloat16)
            h2 = jnp.maximum(
                jnp.dot(w2_cur, h1b, preferred_element_type=jnp.float32)
                + jnp.dot(w2_del, delayed_bf16(h1, d),
                          preferred_element_type=jnp.float32)
                + b2, 0.0)

            h = h2 + res
        o_ref[...] = h

    return kernel


# ------------------------------ host wrapper ------------------------------- #
def _prep_layer(params):
    """Pack one TemporalBlock's weights for the two-dot kernel layout."""
    w1, b1, w2, b2, wn, bn = params
    c_out, c_in, _ = w1.shape
    c_in_pad = _round_up(c_in, 8)                 # sublane-align input channels
    pad = c_in_pad - c_in
    w1p = jnp.pad(w1, ((0, 0), (0, pad), (0, 0))) if pad else w1
    wnp = jnp.pad(wn[:, :, 0], ((0, 0), (0, pad))) if pad else wn[:, :, 0]

    # tap@t rows = [w1[:,:,1] ; wn]  (conv1 current tap + 1x1 residual)
    w_cur = jnp.concatenate([w1p[:, :, 1], wnp], axis=0).astype(jnp.bfloat16)
    w_del = w1p[:, :, 0].astype(jnp.bfloat16)                 # tap@t-d
    b_cur = jnp.concatenate([b1, bn]).reshape(2 * c_out, 1).astype(jnp.float32)
    w2_cur = w2[:, :, 1].astype(jnp.bfloat16)
    w2_del = w2[:, :, 0].astype(jnp.bfloat16)
    b2c = b2.reshape(c_out, 1).astype(jnp.float32)
    return (w_cur, w_del, b_cur, w2_cur, w2_del, b2c), c_in_pad, c_out


def _pick_batch_tile(batch, seq):
    """Largest batch tile bt (bt | batch) whose lane extent bt*seq is a
    multiple of 128 and fits the VMEM budget, preferring >= 2 grid steps so
    both TensorCores on v7x get work.  Returns None if no such tile exists
    (caller falls back to a single zero-padded tile)."""
    total = batch * seq
    budget_lanes = max(128, min(_MAX_TILE_LANES,
                                (24 << 20) // _BYTES_PER_LANE_EST))
    best = None
    for bt in range(1, batch + 1):
        if batch % bt:
            continue
        lanes = bt * seq
        if lanes % 128:
            continue
        if lanes > budget_lanes:
            break
        if total // lanes < 2:      # keep >= 2 grid steps when possible
            continue
        best = bt
    return best


def tcn_forward(x, layers, output_layout="NCT"):
    """x: (B, C_in, T) f32.  layers: list of ((w1,b1,w2,b2,wn,bn), dilation).

    output_layout="NCT" -> (B, C_last, T)  (drop-in PyTorch-module layout)
    output_layout="CBT" -> (C_last, B, T)  (no wrapper-side HBM transpose)
    """
    B, c_in, T = x.shape

    operands, layer_meta = [], []
    c_in_pad0 = None
    macs_per_lane = 0
    cur_in = c_in
    for params, dilation in layers:
        ops, c_in_pad, c_out = _prep_layer(params)
        if c_in_pad0 is None:
            c_in_pad0 = c_in_pad
        operands += list(ops)
        layer_meta.append((c_out, dilation))
        macs_per_lane += 3 * cur_in * c_out + 2 * c_out * c_out
        cur_in = c_out
    c_last = layer_meta[-1][0]

    # Lane-dense batch tiling: each grid step handles `bt` batch elements
    # flattened to a (C, bt*T) slab (batch elements T-contiguous along lanes,
    # starting at lane 0 — required by the in-kernel roll+mask causal delay).
    bt = _pick_batch_tile(B, T)
    if bt is not None:
        lane_tile = bt * T
        total_lanes = B * T
        assert lane_tile % T == 0 and total_lanes % lane_tile == 0
    else:
        lane_tile = _round_up(B * T, 128)     # single padded tile (small inputs)
        total_lanes = lane_tile
    grid = (total_lanes // lane_tile,)

    # NCT -> (C, B*T): channels on sublanes, batch*time on lanes; zero-pad
    # channels to a sublane multiple and lanes to the tile width (pad lanes
    # only produce garbage that is sliced off and never leaks into real lanes).
    xf = x.astype(jnp.float32)
    if c_in_pad0 > c_in:
        xf = jnp.pad(xf, ((0, 0), (0, c_in_pad0 - c_in), (0, 0)))
    x_flat = xf.transpose(1, 0, 2).reshape(c_in_pad0, B * T)
    if total_lanes > B * T:
        x_flat = jnp.pad(x_flat, ((0, 0), (0, total_lanes - B * T)))

    in_specs = [pl.BlockSpec((c_in_pad0, lane_tile), lambda i: (0, i))]
    in_specs += [pl.BlockSpec(op.shape, lambda i: (0, 0)) for op in operands]
    out_specs = pl.BlockSpec((c_last, lane_tile), lambda i: (0, i))

    # VMEM limit kept in sync with the tile (v5e scoped default is only 16 MiB;
    # v7x physical is 64 MiB, so stay well below it).
    vmem_limit = int(min(48 << 20,
                         max(32 << 20, 2 * _BYTES_PER_LANE_EST * lane_tile)))
    weight_bytes = sum(int(np.prod(op.shape)) * op.dtype.itemsize
                       for op in operands)
    cost = pl.CostEstimate(
        flops=int(2 * macs_per_lane * B * T),
        transcendentals=0,
        bytes_accessed=int(x_flat.size * 4 + c_last * total_lanes * 4
                           + weight_bytes))

    out_flat = pl.pallas_call(
        make_tcn_kernel(tuple(layer_meta), T),
        out_shape=jax.ShapeDtypeStruct((c_last, total_lanes), jnp.float32),
        grid=grid,
        in_specs=in_specs,
        out_specs=out_specs,
        compiler_params=pltpu.CompilerParams(
            dimension_semantics=("parallel",),
            vmem_limit_bytes=vmem_limit),
        cost_estimate=cost,
    )(x_flat, *operands)

    # TODO(synk): for very long sequences add a time-tile grid axis
    # ("arbitrary") with a 2*(d1+d2+d3)-sample left halo and global-time masks
    # (or switch to a time-on-lanes layout); per-step VMEM currently grows
    # linearly with T.

    out_cbt = out_flat[:, : B * T].reshape(c_last, B, T)
    if output_layout == "CBT":
        return out_cbt                        # no HBM transpose of the output
    return out_cbt.transpose(1, 0, 2)         # drop-in (B, C_last, T) layout


# ------------------------- deterministic parameters ------------------------ #
def init_params(key, num_inputs, num_channels, kernel_size):
    assert kernel_size == 2, "kernel specialized to kernel_size=2 (module default)"
    layers = []
    for i, out_ch in enumerate(num_channels):
        in_ch = num_inputs if i == 0 else num_channels[i - 1]
        dilation = 2 ** i
        key, *ks = jax.random.split(key, 7)
        s1 = 1.0 / np.sqrt(in_ch * kernel_size)
        s2 = 1.0 / np.sqrt(out_ch * kernel_size)
        sn = 1.0 / np.sqrt(in_ch)
        w1 = jax.random.uniform(ks[0], (out_ch, in_ch, kernel_size), jnp.float32, -s1, s1)
        b1 = jax.random.uniform(ks[1], (out_ch,), jnp.float32, -s1, s1)
        w2 = jax.random.uniform(ks[2], (out_ch, out_ch, kernel_size), jnp.float32, -s2, s2)
        b2 = jax.random.uniform(ks[3], (out_ch,), jnp.float32, -s2, s2)
        wn = jax.random.uniform(ks[4], (out_ch, in_ch, 1), jnp.float32, -sn, sn)
        bn = jax.random.uniform(ks[5], (out_ch,), jnp.float32, -sn, sn)
        layers.append(((w1, b1, w2, b2, wn, bn), dilation))
    return layers


# ------------------------ pure-JAX reference (check) ----------------------- #
def _conv1d_ref(x, w, b, dilation, padding):
    y = jax.lax.conv_general_dilated(
        x, w, window_strides=(1,), padding=[(padding, padding)],
        rhs_dilation=(dilation,), dimension_numbers=("NCH", "OIH", "NCH"),
        precision=jax.lax.Precision.HIGHEST)
    return y + b[None, :, None]


def tcn_ref(x, layers):
    for (w1, b1, w2, b2, wn, bn), d in layers:
        L = x.shape[2]
        h = jax.nn.relu(_conv1d_ref(x, w1, b1, d, d))
        h = jax.nn.relu(_conv1d_ref(h, w2, b2, d, d))
        x = h[:, :, :L] + _conv1d_ref(x, wn, bn, 1, 0)
    return x


# ---------------------------------- main ----------------------------------- #
if __name__ == "__main__":
    key = jax.random.PRNGKey(0)
    kx, kp = jax.random.split(key)

    B, C_IN, T = 2, 4, 16
    x = jax.random.normal(kx, (B, C_IN, T), jnp.float32)
    layers = init_params(kp, C_IN, NUM_CHANNELS, KERNEL_SIZE)

    y = tcn_forward(x, layers)                       # (B, 64, T), module layout
    y = jax.block_until_ready(y)
    assert y.shape == (B, NUM_CHANNELS[-1], T)

    y_ref = tcn_ref(x, layers)
    # bf16 MXU operands with f32 accumulation vs. an f32 HIGHEST-precision
    # reference -> loosened tolerance (per review's bf16 recommendation).
    np.testing.assert_allclose(np.asarray(y), np.asarray(y_ref),
                               rtol=2e-2, atol=2e-2)

    # Transpose-free output layout (review): same numbers, (C_last, B, T).
    y_cbt = jax.block_until_ready(tcn_forward(x, layers, output_layout="CBT"))
    np.testing.assert_allclose(np.asarray(y_cbt),
                               np.asarray(y).transpose(1, 0, 2),
                               rtol=0, atol=1e-6)

    print("KERNEL_OK")
</pallas_src>

<mosaic_0001>
module attributes {stable_mosaic.version = 11 : i64} {
  func.func @kernel(%arg0: i32, %arg1: memref<8x128xf32, #tpu.memory_space<vmem>>, %arg2: memref<32x8xbf16, #tpu.memory_space<vmem>>, %arg3: memref<16x8xbf16, #tpu.memory_space<vmem>>, %arg4: memref<32x1xf32, #tpu.memory_space<vmem>>, %arg5: memref<16x16xbf16, #tpu.memory_space<vmem>>, %arg6: memref<16x16xbf16, #tpu.memory_space<vmem>>, %arg7: memref<16x1xf32, #tpu.memory_space<vmem>>, %arg8: memref<64x16xbf16, #tpu.memory_space<vmem>>, %arg9: memref<32x16xbf16, #tpu.memory_space<vmem>>, %arg10: memref<64x1xf32, #tpu.memory_space<vmem>>, %arg11: memref<32x32xbf16, #tpu.memory_space<vmem>>, %arg12: memref<32x32xbf16, #tpu.memory_space<vmem>>, %arg13: memref<32x1xf32, #tpu.memory_space<vmem>>, %arg14: memref<128x32xbf16, #tpu.memory_space<vmem>>, %arg15: memref<64x32xbf16, #tpu.memory_space<vmem>>, %arg16: memref<128x1xf32, #tpu.memory_space<vmem>>, %arg17: memref<64x64xbf16, #tpu.memory_space<vmem>>, %arg18: memref<64x64xbf16, #tpu.memory_space<vmem>>, %arg19: memref<64x1xf32, #tpu.memory_space<vmem>>, %arg20: memref<64x128xf32, #tpu.memory_space<vmem>>) attributes {dimension_semantics = [#tpu.dimension_semantics<parallel>], iteration_bounds = array<i64: 1>, scalar_prefetch = 0 : i64, scratch_operands = 0 : i64, tpu.core_type = #tpu.core_type<tc>, window_params = [{transform_indices = @transform_0, window_bounds = array<i64: 8, 128>}, {pipeline_mode = #tpu.pipeline_mode<synchronous>, transform_indices = @transform_1, window_bounds = array<i64: 32, 8>}, {pipeline_mode = #tpu.pipeline_mode<synchronous>, transform_indices = @transform_2, window_bounds = array<i64: 16, 8>}, {pipeline_mode = #tpu.pipeline_mode<synchronous>, transform_indices = @transform_3, window_bounds = array<i64: 32, 1>}, {pipeline_mode = #tpu.pipeline_mode<synchronous>, transform_indices = @transform_4, window_bounds = array<i64: 16, 16>}, {pipeline_mode = #tpu.pipeline_mode<synchronous>, transform_indices = @transform_5, window_bounds = array<i64: 16, 16>}, {pipeline_mode = #tpu.pipeline_mode<synchronous>, transform_indices = @transform_6, window_bounds = array<i64: 16, 1>}, {pipeline_mode = #tpu.pipeline_mode<synchronous>, transform_indices = @transform_7, window_bounds = array<i64: 64, 16>}, {pipeline_mode = #tpu.pipeline_mode<synchronous>, transform_indices = @transform_8, window_bounds = array<i64: 32, 16>}, {pipeline_mode = #tpu.pipeline_mode<synchronous>, transform_indices = @transform_9, window_bounds = array<i64: 64, 1>}, {pipeline_mode = #tpu.pipeline_mode<synchronous>, transform_indices = @transform_10, window_bounds = array<i64: 32, 32>}, {pipeline_mode = #tpu.pipeline_mode<synchronous>, transform_indices = @transform_11, window_bounds = array<i64: 32, 32>}, {pipeline_mode = #tpu.pipeline_mode<synchronous>, transform_indices = @transform_12, window_bounds = array<i64: 32, 1>}, {pipeline_mode = #tpu.pipeline_mode<synchronous>, transform_indices = @transform_13, window_bounds = array<i64: 128, 32>}, {pipeline_mode = #tpu.pipeline_mode<synchronous>, transform_indices = @transform_14, window_bounds = array<i64: 64, 32>}, {pipeline_mode = #tpu.pipeline_mode<synchronous>, transform_indices = @transform_15, window_bounds = array<i64: 128, 1>}, {pipeline_mode = #tpu.pipeline_mode<synchronous>, transform_indices = @transform_16, window_bounds = array<i64: 64, 64>}, {pipeline_mode = #tpu.pipeline_mode<synchronous>, transform_indices = @transform_17, window_bounds = array<i64: 64, 64>}, {pipeline_mode = #tpu.pipeline_mode<synchronous>, transform_indices = @transform_18, window_bounds = array<i64: 64, 1>}, {transform_indices = @transform_19, window_bounds = array<i64: 64, 128>}]} {
    %0 = tpu.iota {dimensions = array<i32: 1>} : vector<1x128xi32>
    %c16_i32 = arith.constant 16 : i32
    %c0_i32 = arith.constant 0 : i32
    %1 = arith.cmpi eq, %c16_i32, %c0_i32 : i32
    %c1_i32 = arith.constant 1 : i32
    %2 = arith.select %1, %c1_i32, %c16_i32 : i32
    %3 = vector.broadcast %2 : i32 to vector<1x128xi32>
    %4 = arith.remsi %0, %3 : vector<1x128xi32>
    %c0_i32_0 = arith.constant 0 : i32
    %5 = vector.broadcast %c0_i32_0 : i32 to vector<1x128xi32>
    %6 = arith.cmpi ne, %4, %5 : vector<1x128xi32>
    %c0_i32_1 = arith.constant 0 : i32
    %7 = vector.broadcast %c0_i32_1 : i32 to vector<1x128xi32>
    %8 = arith.cmpi slt, %4, %7 : vector<1x128xi32>
    %c0_i32_2 = arith.constant 0 : i32
    %9 = arith.cmpi slt, %2, %c0_i32_2 : i32
    %10 = vector.broadcast %9 : i1 to vector<1x128xi1>
    %11 = vector.broadcast %10 : vector<1x128xi1> to vector<1x128xi1>
    %12 = arith.xori %8, %11 : vector<1x128xi1>
    %13 = arith.andi %12, %6 : vector<1x128xi1>
    %14 = vector.broadcast %2 : i32 to vector<1x128xi32>
    %15 = arith.addi %4, %14 : vector<1x128xi32>
    %16 = arith.select %13, %15, %4 : vector<1x128xi1>, vector<1x128xi32>
    %c1_i32_3 = arith.constant 1 : i32
    %17 = vector.broadcast %c1_i32_3 : i32 to vector<1x128xi32>
    %18 = arith.cmpi sge, %16, %17 : vector<1x128xi32>
    %19 = arith.extui %18 : vector<1x128xi1> to vector<1x128xi32>
    %20 = arith.sitofp %19 : vector<1x128xi32> to vector<1x128xf32>
    %c2_i32 = arith.constant 2 : i32
    %21 = vector.broadcast %c2_i32 : i32 to vector<1x128xi32>
    %22 = arith.cmpi sge, %16, %21 : vector<1x128xi32>
    %23 = arith.extui %22 : vector<1x128xi1> to vector<1x128xi32>
    %24 = arith.sitofp %23 : vector<1x128xi32> to vector<1x128xf32>
    %c4_i32 = arith.constant 4 : i32
    %25 = vector.broadcast %c4_i32 : i32 to vector<1x128xi32>
    %26 = arith.cmpi sge, %16, %25 : vector<1x128xi32>
    %27 = arith.extui %26 : vector<1x128xi1> to vector<1x128xi32>
    %28 = arith.sitofp %27 : vector<1x128xi32> to vector<1x128xf32>
    %c0 = arith.constant 0 : index
    %c0_4 = arith.constant 0 : index
    %29 = vector.load %arg1[%c0, %c0_4] : memref<8x128xf32, #tpu.memory_space<vmem>>, vector<8x128xf32>
    %c0_5 = arith.constant 0 : index
    %c0_6 = arith.constant 0 : index
    %30 = vector.load %arg2[%c0_5, %c0_6] : memref<32x8xbf16, #tpu.memory_space<vmem>>, vector<32x8xbf16>
    %c0_7 = arith.constant 0 : index
    %c0_8 = arith.constant 0 : index
    %31 = vector.load %arg3[%c0_7, %c0_8] : memref<16x8xbf16, #tpu.memory_space<vmem>>, vector<16x8xbf16>
    %c0_9 = arith.constant 0 : index
    %c0_10 = arith.constant 0 : index
    %32 = vector.load %arg4[%c0_9, %c0_10] : memref<32x1xf32, #tpu.memory_space<vmem>>, vector<32x1xf32>
    %c0_11 = arith.constant 0 : index
    %c0_12 = arith.constant 0 : index
    %33 = vector.load %arg5[%c0_11, %c0_12] : memref<16x16xbf16, #tpu.memory_space<vmem>>, vector<16x16xbf16>
    %c0_13 = arith.constant 0 : index
    %c0_14 = arith.constant 0 : index
    %34 = vector.load %arg6[%c0_13, %c0_14] : memref<16x16xbf16, #tpu.memory_space<vmem>>, vector<16x16xbf16>
    %c0_15 = arith.constant 0 : index
    %c0_16 = arith.constant 0 : index
    %35 = vector.load %arg7[%c0_15, %c0_16] : memref<16x1xf32, #tpu.memory_space<vmem>>, vector<16x1xf32>
    %36 = arith.truncf %29 : vector<8x128xf32> to vector<8x128xbf16>
    %cst = arith.constant dense<0.000000e+00> : vector<32x128xf32>
    %37 = tpu.matmul %30, %36, %cst {dimension_numbers = #tpu.dot_dimension_numbers<[1], [0], [0], [1], [0, 0, 1, 1], [], []>} : vector<32x8xbf16>, vector<8x128xbf16>, vector<32x128xf32> -> vector<32x128xf32>
    %38 = vector.broadcast %32 : vector<32x1xf32> to vector<32x128xf32>
    %39 = arith.addf %37, %38 : vector<32x128xf32>
    %c1_i32_17 = arith.constant 1 : i32
    %40 = tpu.dynamic_rotate %29 by %c1_i32_17 dim 1 : vector<8x128xf32>, i32 -> vector<8x128xf32>
    %41 = vector.broadcast %20 : vector<1x128xf32> to vector<8x128xf32>
    %42 = arith.mulf %40, %41 : vector<8x128xf32>
    %43 = arith.truncf %42 : vector<8x128xf32> to vector<8x128xbf16>
    %cst_18 = arith.constant dense<0.000000e+00> : vector<16x128xf32>
    %44 = tpu.matmul %31, %43, %cst_18 {dimension_numbers = #tpu.dot_dimension_numbers<[1], [0], [0], [1], [0, 0, 1, 1], [], []>} : vector<16x8xbf16>, vector<8x128xbf16>, vector<16x128xf32> -> vector<16x128xf32>
    %45 = vector.extract_strided_slice %39 {offsets = [0, 0], sizes = [16, 128], strides = [1, 1]} : vector<32x128xf32> to vector<16x128xf32>
    %46 = arith.addf %45, %44 : vector<16x128xf32>
    %cst_19 = arith.constant 0.000000e+00 : f32
    %47 = vector.broadcast %cst_19 : f32 to vector<16x128xf32>
    %48 = arith.maximumf %46, %47 : vector<16x128xf32>
    %49 = vector.extract_strided_slice %39 {offsets = [16, 0], sizes = [16, 128], strides = [1, 1]} : vector<32x128xf32> to vector<16x128xf32>
    %50 = arith.truncf %48 : vector<16x128xf32> to vector<16x128xbf16>
    %cst_20 = arith.constant dense<0.000000e+00> : vector<16x128xf32>
    %51 = tpu.matmul %33, %50, %cst_20 {dimension_numbers = #tpu.dot_dimension_numbers<[1], [0], [0], [1], [0, 0, 1, 1], [], []>} : vector<16x16xbf16>, vector<16x128xbf16>, vector<16x128xf32> -> vector<16x128xf32>
    %c1_i32_21 = arith.constant 1 : i32
    %52 = tpu.dynamic_rotate %48 by %c1_i32_21 dim 1 : vector<16x128xf32>, i32 -> vector<16x128xf32>
    %53 = vector.broadcast %20 : vector<1x128xf32> to vector<16x128xf32>
    %54 = arith.mulf %52, %53 : vector<16x128xf32>
    %55 = arith.truncf %54 : vector<16x128xf32> to vector<16x128xbf16>
    %cst_22 = arith.constant dense<0.000000e+00> : vector<16x128xf32>
    %56 = tpu.matmul %34, %55, %cst_22 {dimension_numbers = #tpu.dot_dimension_numbers<[1], [0], [0], [1], [0, 0, 1, 1], [], []>} : vector<16x16xbf16>, vector<16x128xbf16>, vector<16x128xf32> -> vector<16x128xf32>
    %57 = arith.addf %51, %56 : vector<16x128xf32>
    %58 = vector.broadcast %35 : vector<16x1xf32> to vector<16x128xf32>
    %59 = arith.addf %57, %58 : vector<16x128xf32>
    %cst_23 = arith.constant 0.000000e+00 : f32
    %60 = vector.broadcast %cst_23 : f32 to vector<16x128xf32>
    %61 = arith.maximumf %59, %60 : vector<16x128xf32>
    %62 = arith.addf %61, %49 : vector<16x128xf32>
    %c0_24 = arith.constant 0 : index
    %c0_25 = arith.constant 0 : index
    %63 = vector.load %arg8[%c0_24, %c0_25] : memref<64x16xbf16, #tpu.memory_space<vmem>>, vector<64x16xbf16>
    %c0_26 = arith.constant 0 : index
    %c0_27 = arith.constant 0 : index
    %64 = vector.load %arg9[%c0_26, %c0_27] : memref<32x16xbf16, #tpu.memory_space<vmem>>, vector<32x16xbf16>
    %c0_28 = arith.constant 0 : index
    %c0_29 = arith.constant 0 : index
    %65 = vector.load %arg10[%c0_28, %c0_29] : memref<64x1xf32, #tpu.memory_space<vmem>>, vector<64x1xf32>
    %c0_30 = arith.constant 0 : index
    %c0_31 = arith.constant 0 : index
    %66 = vector.load %arg11[%c0_30, %c0_31] : memref<32x32xbf16, #tpu.memory_space<vmem>>, vector<32x32xbf16>
    %c0_32 = arith.constant 0 : index
    %c0_33 = arith.constant 0 : index
    %67 = vector.load %arg12[%c0_32, %c0_33] : memref<32x32xbf16, #tpu.memory_space<vmem>>, vector<32x32xbf16>
    %c0_34 = arith.constant 0 : index
    %c0_35 = arith.constant 0 : index
    %68 = vector.load %arg13[%c0_34, %c0_35] : memref<32x1xf32, #tpu.memory_space<vmem>>, vector<32x1xf32>
    %69 = arith.truncf %62 : vector<16x128xf32> to vector<16x128xbf16>
    %cst_36 = arith.constant dense<0.000000e+00> : vector<64x128xf32>
    %70 = tpu.matmul %63, %69, %cst_36 {dimension_numbers = #tpu.dot_dimension_numbers<[1], [0], [0], [1], [0, 0, 1, 1], [], []>} : vector<64x16xbf16>, vector<16x128xbf16>, vector<64x128xf32> -> vector<64x128xf32>
    %71 = vector.broadcast %65 : vector<64x1xf32> to vector<64x128xf32>
    %72 = arith.addf %70, %71 : vector<64x128xf32>
    %c2_i32_37 = arith.constant 2 : i32
    %73 = tpu.dynamic_rotate %62 by %c2_i32_37 dim 1 : vector<16x128xf32>, i32 -> vector<16x128xf32>
    %74 = vector.broadcast %24 : vector<1x128xf32> to vector<16x128xf32>
    %75 = arith.mulf %73, %74 : vector<16x128xf32>
    %76 = arith.truncf %75 : vector<16x128xf32> to vector<16x128xbf16>
    %cst_38 = arith.constant dense<0.000000e+00> : vector<32x128xf32>
    %77 = tpu.matmul %64, %76, %cst_38 {dimension_numbers = #tpu.dot_dimension_numbers<[1], [0], [0], [1], [0, 0, 1, 1], [], []>} : vector<32x16xbf16>, vector<16x128xbf16>, vector<32x128xf32> -> vector<32x128xf32>
    %78 = vector.extract_strided_slice %72 {offsets = [0, 0], sizes = [32, 128], strides = [1, 1]} : vector<64x128xf32> to vector<32x128xf32>
    %79 = arith.addf %78, %77 : vector<32x128xf32>
    %cst_39 = arith.constant 0.000000e+00 : f32
    %80 = vector.broadcast %cst_39 : f32 to vector<32x128xf32>
    %81 = arith.maximumf %79, %80 : vector<32x128xf32>
    %82 = vector.extract_strided_slice %72 {offsets = [32, 0], sizes = [32, 128], strides = [1, 1]} : vector<64x128xf32> to vector<32x128xf32>
    %83 = arith.truncf %81 : vector<32x128xf32> to vector<32x128xbf16>
    %cst_40 = arith.constant dense<0.000000e+00> : vector<32x128xf32>
    %84 = tpu.matmul %66, %83, %cst_40 {dimension_numbers = #tpu.dot_dimension_numbers<[1], [0], [0], [1], [0, 0, 1, 1], [], []>} : vector<32x32xbf16>, vector<32x128xbf16>, vector<32x128xf32> -> vector<32x128xf32>
    %c2_i32_41 = arith.constant 2 : i32
    %85 = tpu.dynamic_rotate %81 by %c2_i32_41 dim 1 : vector<32x128xf32>, i32 -> vector<32x128xf32>
    %86 = vector.broadcast %24 : vector<1x128xf32> to vector<32x128xf32>
    %87 = arith.mulf %85, %86 : vector<32x128xf32>
    %88 = arith.truncf %87 : vector<32x128xf32> to vector<32x128xbf16>
    %cst_42 = arith.constant dense<0.000000e+00> : vector<32x128xf32>
    %89 = tpu.matmul %67, %88, %cst_42 {dimension_numbers = #tpu.dot_dimension_numbers<[1], [0], [0], [1], [0, 0, 1, 1], [], []>} : vector<32x32xbf16>, vector<32x128xbf16>, vector<32x128xf32> -> vector<32x128xf32>
    %90 = arith.addf %84, %89 : vector<32x128xf32>
    %91 = vector.broadcast %68 : vector<32x1xf32> to vector<32x128xf32>
    %92 = arith.addf %90, %91 : vector<32x128xf32>
    %cst_43 = arith.constant 0.000000e+00 : f32
    %93 = vector.broadcast %cst_43 : f32 to vector<32x128xf32>
    %94 = arith.maximumf %92, %93 : vector<32x128xf32>
    %95 = arith.addf %94, %82 : vector<32x128xf32>
    %c0_44 = arith.constant 0 : index
    %c0_45 = arith.constant 0 : index
    %96 = vector.load %arg14[%c0_44, %c0_45] : memref<128x32xbf16, #tpu.memory_space<vmem>>, vector<128x32xbf16>
    %c0_46 = arith.constant 0 : index
    %c0_47 = arith.constant 0 : index
    %97 = vector.load %arg15[%c0_46, %c0_47] : memref<64x32xbf16, #tpu.memory_space<vmem>>, vector<64x32xbf16>
    %c0_48 = arith.constant 0 : index
    %c0_49 = arith.constant 0 : index
    %98 = vector.load %arg16[%c0_48, %c0_49] : memref<128x1xf32, #tpu.memory_space<vmem>>, vector<128x1xf32>
    %c0_50 = arith.constant 0 : index
    %c0_51 = arith.constant 0 : index
    %99 = vector.load %arg17[%c0_50, %c0_51] : memref<64x64xbf16, #tpu.memory_space<vmem>>, vector<64x64xbf16>
    %c0_52 = arith.constant 0 : index
    %c0_53 = arith.constant 0 : index
    %100 = vector.load %arg18[%c0_52, %c0_53] : memref<64x64xbf16, #tpu.memory_space<vmem>>, vector<64x64xbf16>
    %c0_54 = arith.constant 0 : index
    %c0_55 = arith.constant 0 : index
    %101 = vector.load %arg19[%c0_54, %c0_55] : memref<64x1xf32, #tpu.memory_space<vmem>>, vector<64x1xf32>
    %102 = arith.truncf %95 : vector<32x128xf32> to vector<32x128xbf16>
    %cst_56 = arith.constant dense<0.000000e+00> : vector<128x128xf32>
    %103 = tpu.matmul %96, %102, %cst_56 {dimension_numbers = #tpu.dot_dimension_numbers<[1], [0], [0], [1], [0, 0, 1, 1], [], []>} : vector<128x32xbf16>, vector<32x128xbf16>, vector<128x128xf32> -> vector<128x128xf32>
    %104 = vector.broadcast %98 : vector<128x1xf32> to vector<128x128xf32>
    %105 = arith.addf %103, %104 : vector<128x128xf32>
    %c4_i32_57 = arith.constant 4 : i32
    %106 = tpu.dynamic_rotate %95 by %c4_i32_57 dim 1 : vector<32x128xf32>, i32 -> vector<32x128xf32>
    %107 = vector.broadcast %28 : vector<1x128xf32> to vector<32x128xf32>
    %108 = arith.mulf %106, %107 : vector<32x128xf32>
    %109 = arith.truncf %108 : vector<32x128xf32> to vector<32x128xbf16>
    %cst_58 = arith.constant dense<0.000000e+00> : vector<64x128xf32>
    %110 = tpu.matmul %97, %109, %cst_58 {dimension_numbers = #tpu.dot_dimension_numbers<[1], [0], [0], [1], [0, 0, 1, 1], [], []>} : vector<64x32xbf16>, vector<32x128xbf16>, vector<64x128xf32> -> vector<64x128xf32>
    %111 = vector.extract_strided_slice %105 {offsets = [0, 0], sizes = [64, 128], strides = [1, 1]} : vector<128x128xf32> to vector<64x128xf32>
    %112 = arith.addf %111, %110 : vector<64x128xf32>
    %cst_59 = arith.constant 0.000000e+00 : f32
    %113 = vector.broadcast %cst_59 : f32 to vector<64x128xf32>
    %114 = arith.maximumf %112, %113 : vector<64x128xf32>
    %115 = vector.extract_strided_slice %105 {offsets = [64, 0], sizes = [64, 128], strides = [1, 1]} : vector<128x128xf32> to vector<64x128xf32>
    %116 = arith.truncf %114 : vector<64x128xf32> to vector<64x128xbf16>
    %cst_60 = arith.constant dense<0.000000e+00> : vector<64x128xf32>
    %117 = tpu.matmul %99, %116, %cst_60 {dimension_numbers = #tpu.dot_dimension_numbers<[1], [0], [0], [1], [0, 0, 1, 1], [], []>} : vector<64x64xbf16>, vector<64x128xbf16>, vector<64x128xf32> -> vector<64x128xf32>
    %c4_i32_61 = arith.constant 4 : i32
    %118 = tpu.dynamic_rotate %114 by %c4_i32_61 dim 1 : vector<64x128xf32>, i32 -> vector<64x128xf32>
    %119 = vector.broadcast %28 : vector<1x128xf32> to vector<64x128xf32>
    %120 = arith.mulf %118, %119 : vector<64x128xf32>
    %121 = arith.truncf %120 : vector<64x128xf32> to vector<64x128xbf16>
    %cst_62 = arith.constant dense<0.000000e+00> : vector<64x128xf32>
    %122 = tpu.matmul %100, %121, %cst_62 {dimension_numbers = #tpu.dot_dimension_numbers<[1], [0], [0], [1], [0, 0, 1, 1], [], []>} : vector<64x64xbf16>, vector<64x128xbf16>, vector<64x128xf32> -> vector<64x128xf32>
    %123 = arith.addf %117, %122 : vector<64x128xf32>
    %124 = vector.broadcast %101 : vector<64x1xf32> to vector<64x128xf32>
    %125 = arith.addf %123, %124 : vector<64x128xf32>
    %cst_63 = arith.constant 0.000000e+00 : f32
    %126 = vector.broadcast %cst_63 : f32 to vector<64x128xf32>
    %127 = arith.maximumf %125, %126 : vector<64x128xf32>
    %128 = arith.addf %127, %115 : vector<64x128xf32>
    %c0_64 = arith.constant 0 : index
    %c0_65 = arith.constant 0 : index
    %129 = vector.load %arg20[%c0_64, %c0_65] : memref<64x128xf32, #tpu.memory_space<vmem>>, vector<64x128xf32>
    tpu.vector_store %arg20[%c0_64, %c0_65], %128 {strides = array<i32>} : memref<64x128xf32, #tpu.memory_space<vmem>>, vector<64x128xf32>,
    return
  }
  func.func @transform_0(%arg0: i32) -> (i32, i32) {
    %c0_i32 = arith.constant 0 : i32
    %c0_i32_0 = arith.constant 0 : i32
    return %c0_i32, %arg0 : i32, i32
  }
  func.func @transform_1(%arg0: i32) -> (i32, i32) {
    %c0_i32 = arith.constant 0 : i32
    %c0_i32_0 = arith.constant 0 : i32
    %c0_i32_1 = arith.constant 0 : i32
    return %c0_i32, %c0_i32_0 : i32, i32
  }
  func.func @transform_2(%arg0: i32) -> (i32, i32) {
    %c0_i32 = arith.constant 0 : i32
    %c0_i32_0 = arith.constant 0 : i32
    %c0_i32_1 = arith.constant 0 : i32
    return %c0_i32, %c0_i32_0 : i32, i32
  }
  func.func @transform_3(%arg0: i32) -> (i32, i32) {
    %c0_i32 = arith.constant 0 : i32
    %c0_i32_0 = arith.constant 0 : i32
    %c0_i32_1 = arith.constant 0 : i32
    return %c0_i32, %c0_i32_0 : i32, i32
  }
  func.func @transform_4(%arg0: i32) -> (i32, i32) {
    %c0_i32 = arith.constant 0 : i32
    %c0_i32_0 = arith.constant 0 : i32
    %c0_i32_1 = arith.constant 0 : i32
    return %c0_i32, %c0_i32_0 : i32, i32
  }
  func.func @transform_5(%arg0: i32) -> (i32, i32) {
    %c0_i32 = arith.constant 0 : i32
    %c0_i32_0 = arith.constant 0 : i32
    %c0_i32_1 = arith.constant 0 : i32
    return %c0_i32, %c0_i32_0 : i32, i32
  }
  func.func @transform_6(%arg0: i32) -> (i32, i32) {
    %c0_i32 = arith.constant 0 : i32
    %c0_i32_0 = arith.constant 0 : i32
    %c0_i32_1 = arith.constant 0 : i32
    return %c0_i32, %c0_i32_0 : i32, i32
  }
  func.func @transform_7(%arg0: i32) -> (i32, i32) {
    %c0_i32 = arith.constant 0 : i32
    %c0_i32_0 = arith.constant 0 : i32
    %c0_i32_1 = arith.constant 0 : i32
    return %c0_i32, %c0_i32_0 : i32, i32
  }
  func.func @transform_8(%arg0: i32) -> (i32, i32) {
    %c0_i32 = arith.constant 0 : i32
    %c0_i32_0 = arith.constant 0 : i32
    %c0_i32_1 = arith.constant 0 : i32
    return %c0_i32, %c0_i32_0 : i32, i32
  }
  func.func @transform_9(%arg0: i32) -> (i32, i32) {
    %c0_i32 = arith.constant 0 : i32
    %c0_i32_0 = arith.constant 0 : i32
    %c0_i32_1 = arith.constant 0 : i32
    return %c0_i32, %c0_i32_0 : i32, i32
  }
  func.func @transform_10(%arg0: i32) -> (i32, i32) {
    %c0_i32 = arith.constant 0 : i32
    %c0_i32_0 = arith.constant 0 : i32
    %c0_i32_1 = arith.constant 0 : i32
    return %c0_i32, %c0_i32_0 : i32, i32
  }
  func.func @transform_11(%arg0: i32) -> (i32, i32) {
    %c0_i32 = arith.constant 0 : i32
    %c0_i32_0 = arith.constant 0 : i32
    %c0_i32_1 = arith.constant 0 : i32
    return %c0_i32, %c0_i32_0 : i32, i32
  }
  func.func @transform_12(%arg0: i32) -> (i32, i32) {
    %c0_i32 = arith.constant 0 : i32
    %c0_i32_0 = arith.constant 0 : i32
    %c0_i32_1 = arith.constant 0 : i32
    return %c0_i32, %c0_i32_0 : i32, i32
  }
  func.func @transform_13(%arg0: i32) -> (i32, i32) {
    %c0_i32 = arith.constant 0 : i32
    %c0_i32_0 = arith.constant 0 : i32
    %c0_i32_1 = arith.constant 0 : i32
    return %c0_i32, %c0_i32_0 : i32, i32
  }
  func.func @transform_14(%arg0: i32) -> (i32, i32) {
    %c0_i32 = arith.constant 0 : i32
    %c0_i32_0 = arith.constant 0 : i32
    %c0_i32_1 = arith.constant 0 : i32
    return %c0_i32, %c0_i32_0 : i32, i32
  }
  func.func @transform_15(%arg0: i32) -> (i32, i32) {
    %c0_i32 = arith.constant 0 : i32
    %c0_i32_0 = arith.constant 0 : i32
    %c0_i32_1 = arith.constant 0 : i32
    return %c0_i32, %c0_i32_0 : i32, i32
  }
  func.func @transform_16(%arg0: i32) -> (i32, i32) {
    %c0_i32 = arith.constant 0 : i32
    %c0_i32_0 = arith.constant 0 : i32
    %c0_i32_1 = arith.constant 0 : i32
    return %c0_i32, %c0_i32_0 : i32, i32
  }
  func.func @transform_17(%arg0: i32) -> (i32, i32) {
    %c0_i32 = arith.constant 0 : i32
    %c0_i32_0 = arith.constant 0 : i32
    %c0_i32_1 = arith.constant 0 : i32
    return %c0_i32, %c0_i32_0 : i32, i32
  }
  func.func @transform_18(%arg0: i32) -> (i32, i32) {
    %c0_i32 = arith.constant 0 : i32
    %c0_i32_0 = arith.constant 0 : i32
    %c0_i32_1 = arith.constant 0 : i32
    return %c0_i32, %c0_i32_0 : i32, i32
  }
  func.func @transform_19(%arg0: i32) -> (i32, i32) {
    %c0_i32 = arith.constant 0 : i32
    %c0_i32_0 = arith.constant 0 : i32
    return %c0_i32, %arg0 : i32, i32
  }
}

</mosaic_0001>

<bundles_post_ra>
// kernel: tpu_custom_call.1
= control target key start
LH: loop header
LB: loop body
LE: loop exit
PB: predicated region body
PF: predicated region fallthrough
CT: control target
= control target key end

     0   :  { %s2418_s0 = inlined_call_operand.vmem [shape: f32[8,128], index: 0, kind: input, shape index: {}]   ;;  %s2419_s1 = inlined_call_operand.vmem [shape: bf16[32,8], index: 1, kind: input, shape index: {}]   ;;  %s2420_s2 = inlined_call_operand.vmem [shape: bf16[16,8], index: 2, kind: input, shape index: {}]   ;;  %s2421_s3 = inlined_call_operand.vmem [shape: f32[32,1], index: 3, kind: input, shape index: {}]   ;;  %s2422_s4 = inlined_call_operand.vmem [shape: bf16[16,16], index: 4, kind: input, shape index: {}]   ;;  %s2423_s5 = inlined_call_operand.vmem [shape: bf16[16,16], index: 5, kind: input, shape index: {}]   ;;  %s2424_s6 = inlined_call_operand.vmem [shape: f32[16,1], index: 6, kind: input, shape index: {}]   ;;  %s2425_s7 = inlined_call_operand.vmem [shape: bf16[64,16], index: 7, kind: input, shape index: {}]   ;;  %s2426_s8 = inlined_call_operand.vmem [shape: bf16[32,16], index: 8, kind: input, shape index: {}]   ;;  %s2427_s9 = inlined_call_operand.vmem [shape: f32[64,1], index: 9, kind: input, shape index: {}]   ;;  %s2428_s10 = inlined_call_operand.vmem [shape: bf16[32,32], index: 10, kind: input, shape index: {}]   ;;  %s2429_s11 = inlined_call_operand.vmem [shape: bf16[32,32], index: 11, kind: input, shape index: {}]   ;;  %s2430_s12 = inlined_call_operand.vmem [shape: f32[32,1], index: 12, kind: input, shape index: {}]   ;;  %s2431_s13 = inlined_call_operand.vmem [shape: bf16[128,32], index: 13, kind: input, shape index: {}]   ;;  %s2432_s14 = inlined_call_operand.vmem [shape: bf16[64,32], index: 14, kind: input, shape index: {}]   ;;  %s2433_s15 = inlined_call_operand.vmem [shape: f32[128,1], index: 15, kind: input, shape index: {}]   ;;  %s2434_s16 = inlined_call_operand.vmem [shape: bf16[64,64], index: 16, kind: input, shape index: {}]   ;;  %s2435_s17 = inlined_call_operand.vmem [shape: bf16[64,64], index: 17, kind: input, shape index: {}]   ;;  %s2436_s18 = inlined_call_operand.vmem [shape: f32[64,1], index: 18, kind: input, shape index: {}]   ;;  %s2437_s19 = inlined_call_operand.hbm [shape: f32[64,128], index: 19, kind: output, shape index: {}]  }
   0x1   :  { %2440 = sst [smem:[#allocation5_spill]] %s2418_s0 }
   0x2   :  { %2441 = sst [smem:[#allocation6_spill]] %s2419_s1 }
   0x3   :  { %2442 = sst [smem:[#allocation7_spill]] %s2420_s2 }
   0x4   :  { %2443 = sst [smem:[#allocation8_spill]] %s2421_s3 }
   0x5   :  { %s2444_s20 = sld [smem:[#allocation5_spill]]  ;;  %vm142_vm0 = vcmask 1043456   ;;  %s1913_s21 = smov 1   ;;  %vm135_vm1 = vcmask 64512   ;;  %v1914_v3 = vmov 0.0   ;;  %vm1915_vm2 = vmmov 0  }
   0x6   :  { %s2445_s2 = sld [smem:[#allocation6_spill]]  ;;  %1692 = vmatprep.subr.bf16.mxu1 %v1914_v3  ;;  %1694 = vmatprep.mubr.msk.bf16.mxu1 %vm1915_vm2, %v1914_v3  ;;  %s2446_s26 = sld [smem:[#allocation8_spill]]  ;;  %v1916_v8 = vmov 0   ;;  %v102_v9 = vld [vmem:[%s2424_s6] sm:$0xff] }
   0x7   :  { %1852 = vset.pattern.permute.xlu0 %v1916_v8  ;;  %1853 = vset.pattern.permute.xlu1 %v1916_v8 }
   0xb   :  { %v87_v0 = vld [vmem:[%s2444_s20] sm:$0xff] }
   0xc   :  { %195 = vrot.lane.b32.xlu0 %v87_v0, %s1913_s21  ;;  %v104_v1 = vpack.c.bf16 %v87_v0, %v87_v0  ;;  %v1854_v2 = vld [vmem:[%s2445_s2] sm:$0xff]   ;;  %v1855_v4 = vld [vmem:[%s2445_s2 + $0x8] sm:$0xff]   ;;  %v96_v10 = vld [vmem:[%s2446_s26 + $0x10] sm:$0xff] }
   0xd   :  { %1688 = vmatprep.mubr.msk.bf16.mxu0 %vm135_vm1, %v1854_v2  ;;  %v94_v6 = vld [vmem:[%s2446_s26] sm:$0xff]  ;;  %v95_v7 = vld [vmem:[%s2446_s26 + $0x8] sm:$0xff] }
   0xe   :  { %1842 = vmatprep.subr.msk.bf16.mxu0 %vm142_vm0, %v104_v1  ;;  %v144_v5 = vsel %vm142_vm0, %v104_v1, 0  ;;  %112 = vperm.xlu1 %1853, %v95_v7  }
   0xf   :  { %1687 = vmatpush3.bf16.msra.mxu0 %v144_v5 }
  0x10   :  { %107 = vperm.xlu0 %1852, %v94_v6   ;;  %1698 = vmatprep.subr.bf16.mxu0 %v1914_v3 }
  0x12   :  { %1689 = vmatmul.mubr.msk.bf16.vlgmr.msra.gmra.mrb[0].mxu0 %vm135_vm1, %v1855_v4 }
  0x13   :  { %1700 = vmatprep.mubr.msk.bf16.mxu0 %vm1915_vm2, %v1914_v3 }
  0x14   :  { %364 = vperm.xlu0 %1852, %v102_v9  }
  0x18   :  { %117 = vperm.xlu0 %1852, %v96_v10  }
  0x19   :  { %24 = vsyncpa [#allocation3], 0  ;;  %v64_v11 = vlaneseq  ;;  %s2447_s2 = sld [smem:[#allocation7_spill]]  ;;  %v1857_v37 = vld [vmem:[%s2422_s4] sm:$0xff]   ;;  %vm268_vm4 = vcmask 130048   ;;  %v103_v38 = vld [vmem:[%s2424_s6 + $0x8] sm:$0xff] }
  0x1a   :  { %v97_v39 = vld [vmem:[%s2446_s26 + $0x18] sm:$0xff]  ;;  %v1858_v45 = vld [vmem:[%s2423_s5] sm:$0xff]   ;;  %s1917_s5 = smov 2   ;;  %v391_v8 = vld [vmem:[%s2427_s9 + $0x8] sm:$0xff]  ;;  %vm654_vm6 = vcmask 261120   ;;  %vm1293_vm8 = vcmask 523264  }
  0x1b   :  { %v65_v12 = vand.u32 127, %v64_v11  ;;  %v1859_v50 = vld [vmem:[%s2425_s7] sm:$0xff]   ;;  %v1860_v9 = vld [vmem:[%s2425_s7 + $0x8] sm:$0xff]   ;;  %v392_v10 = vld [vmem:[%s2427_s9 + $0x10] sm:$0xff] }
  0x1c   :  { %v390_v6 = vld [vmem:[%s2427_s9] sm:$0xff]  ;;  %v1861_v11 = vld [vmem:[%s2425_s7 + $0x10] sm:$0xff]  }
  0x1d   :  { %v2054_v13 = vand.u32 15, %v65_v12  ;;  %v393_v12 = vld [vmem:[%s2427_s9 + $0x18] sm:$0xff] }
  0x1f   :  { %vm78_vm3 = vcmp.ge.s32.totalorder %v2054_v13, 1  ;;  %v1856_v19 = vld [vmem:[%s2447_s2] sm:$0xff]   ;;  %vm81_vm5 = vcmp.ge.s32.totalorder %v2054_v13, 2  ;;  %vm84_vm7 = vcmp.ge.s32.totalorder %v2054_v13, 4  ;;  %v1879_v13 = vld [vmem:[%s2432_s14 + $0x10] sm:$0xff]  }
  0x20   :  { %v1556_v14 = vsel %vm78_vm3, 1.0, %v1914_v3 }
  0x7e   :  { %v196_v15 = vpop.permute.xlu0 %195 }
  0x7f   :  { %v197_v16 = vmul.f32 %v1556_v14, %v196_v15  ;;  %v1863_v15 = vld [vmem:[%s2426_s8] sm:$0xff]  }
  0x81   :  { %v198_v17 = vpack.c.bf16 %v197_v16, %v197_v16  ;;  %v2118_v16 = vsel %vm81_vm5, 1.0, %v1914_v3 }
  0x83   :  { %v208_v18 = vsel %vm142_vm0, %v198_v17, 0 }
  0x84   :  { %1693 = vmatpush3.bf16.msra.mxu1 %v208_v18 }
  0x85   :  { %1704 = vmatprep.subr.bf16.mxu1 %v1914_v3 }
  0x87   :  { %1695 = vmatmul.mubr.msk.bf16.vlgmr.msra.gmra.mrb[0].mxu1 %vm135_vm1, %v1856_v19 }
  0x88   :  { %1706 = vmatprep.mubr.msk.bf16.mxu1 %vm1915_vm2, %v1914_v3 }
  0x8d   :  { %v113_v26 = vpop.permute.xlu1 %112 }
  0x8f   :  { %v108_v24 = vpop.permute.xlu0 %107 }
  0x93   :  { %v365_v51 = vpop.permute.xlu0 %364 }
  0x97   :  { %v118_v56 = vpop.permute.xlu0 %117 }
  0xe5   :  { %v1690_v20 = vpop.f32.mrb[0].mxu0 }
  0xe6   :  { %v180_v21 = vpop.f32.mrb[1].mxu0  ;;  %v189_v62 = vadd.f32 %v1690_v20, %v118_v56 }
  0xe7   :  { %v1691_v22 = vpop.f32.mrb[2].mxu0  ;;  %v181_v25 = vadd.f32 %v180_v21, %v108_v24 }
  0xe8   :  { %v183_v23 = vpop.f32.mrb[3].mxu0 }
  0xe9   :  { %v184_v28 = vadd.f32 %v183_v23, %v113_v26 }
 0x15a   :  { %v244_v27 = vpop.f32.mrb[0].mxu1 }
 0x15b   :  { %v251_v29 = vadd.f32 %v244_v27, %v181_v25  ;;  %v1696_v30 = vpop.f32.mrb[1].mxu1 }
 0x15c   :  { %v247_v31 = vpop.f32.mrb[2].mxu1 }
 0x15d   :  { %v253_v32 = vmax.f32 %v251_v29, 0.0  ;;  %v252_v33 = vadd.f32 %v247_v31, %v184_v28  ;;  %v1697_v34 = vpop.f32.mrb[3].mxu1 }
 0x15f   :  { %v254_v35 = vmax.f32 %v252_v33, 0.0  ;;  %256 = vrot.lane.b32.xlu1 %v253_v32, %s1913_s21 }
 0x161   :  { %v255_v36 = vpack.c.bf16 %v254_v35, %v253_v32 }
 0x163   :  { %258 = vrot.lane.b32.xlu1 %v254_v35, %s1913_s21  ;;  %1705 = vmatpush3.bf16.msra.mxu1 %v255_v36 }
 0x166   :  { %1707 = vmatmul.mubr.msk.bf16.vlgmr.msra.gmra.mrb[4].mxu1 %vm268_vm4, %v1857_v37 }
 0x167   :  { %369 = vperm.xlu1 %1853, %v103_v38  }
 0x16b   :  { %122 = vperm.xlu1 %1853, %v97_v39  }
 0x1d1   :  { %v257_v40 = vpop.permute.xlu1 %256 }
 0x1d2   :  { %v260_v42 = vmul.f32 %v1556_v14, %v257_v40  ;;  %v1865_v40 = vld [vmem:[%s2429_s11] sm:$0xff]  }
 0x1d3   :  { %1730 = vmatprep.mubr.msk.bf16.mxu1 %vm654_vm6, %v1865_v40  ;;  %v1871_v40 = vld [vmem:[%s2431_s13 + $0x10] sm:$0xff]  }
 0x1d5   :  { %v259_v41 = vpop.permute.xlu1 %258 }
 0x1d6   :  { %v261_v43 = vmul.f32 %v1556_v14, %v259_v41  ;;  %v1862_v14 = vld [vmem:[%s2425_s7 + $0x18] sm:$0xff]  }
 0x1d8   :  { %v262_v44 = vpack.c.bf16 %v261_v43, %v260_v42 }
 0x1da   :  { %1699 = vmatpush3.bf16.msra.mxu0 %v262_v44 }
 0x1dd   :  { %1701 = vmatmul.mubr.msk.bf16.vlgmr.msra.gmra.mrb[4].mxu0 %vm268_vm4, %v1858_v45 }
 0x1de   :  { %1712 = vmatprep.mubr.msk.bf16.mxu0 %vm268_vm4, %v1859_v50  ;;  %v408_v50 = vld [vmem:[%s2430_s12 + $0x10] sm:$0xff] }
 0x1e6   :  { %v370_v52 = vpop.permute.xlu1 %369 }
 0x1ea   :  { %v123_v61 = vpop.permute.xlu1 %122 }
 0x1eb   :  { %v192_v1 = vadd.f32 %v1691_v22, %v123_v61  ;;  %v1864_v22 = vld [vmem:[%s2426_s8 + $0x8] sm:$0xff]  }
 0x239   :  { %v355_v46 = vpop.f32.mrb[4].mxu1 }
 0x23a   :  { %v1708_v47 = vpop.f32.mrb[5].mxu1 }
 0x23b   :  { %v358_v48 = vpop.f32.mrb[6].mxu1  ;;  %v407_v47 = vld [vmem:[%s2430_s12 + $0x8] sm:$0xff] }
 0x23c   :  { %v1709_v49 = vpop.f32.mrb[7].mxu1 }
 0x23d   :  { %v395_v49 = vld [vmem:[%s2427_s9 + $0x28] sm:$0xff] }
 0x2b0   :  { %v306_v53 = vpop.f32.mrb[4].mxu0 }
 0x2b1   :  { %v356_v54 = vadd.f32 %v355_v46, %v306_v53  ;;  %v1702_v55 = vpop.f32.mrb[5].mxu0  ;;  %v406_v46 = vld [vmem:[%s2430_s12] sm:$0xff]  ;;  %v397_v53 = vld [vmem:[%s2427_s9 + $0x38] sm:$0xff] }
 0x2b2   :  { %v309_v57 = vpop.f32.mrb[6].mxu0 }
 0x2b3   :  { %v372_v58 = vadd.f32 %v365_v51, %v356_v54  ;;  %v359_v59 = vadd.f32 %v358_v48, %v309_v57  ;;  %v1703_v60 = vpop.f32.mrb[7].mxu0  ;;  %v394_v48 = vld [vmem:[%s2427_s9 + $0x20] sm:$0xff]  ;;  %v409_v51 = vld [vmem:[%s2430_s12 + $0x18] sm:$0xff] }
 0x2b5   :  { %v374_v63 = vmax.f32 %v372_v58, 0.0  ;;  %v373_v0 = vadd.f32 %v370_v52, %v359_v59  ;;  %v396_v52 = vld [vmem:[%s2427_s9 + $0x30] sm:$0xff] }
 0x2b7   :  { %v375_v2 = vmax.f32 %v373_v0, 0.0  ;;  %v376_v4 = vadd.f32 %v374_v63, %v189_v62  ;;  %v1866_v0 = vld [vmem:[%s2429_s11 + $0x8] sm:$0xff]  }
 0x2b9   :  { %548 = vrot.lane.b32.xlu0 %v376_v4, %s1917_s5  ;;  %v377_v5 = vadd.f32 %v375_v2, %v192_v1  ;;  %v1867_v1 = vld [vmem:[%s2428_s10] sm:$0xff]   ;;  %v1868_v2 = vld [vmem:[%s2428_s10 + $0x8] sm:$0xff]   ;;  %s1918_s10 = smov 4  }
 0x2bb   :  { %550 = vrot.lane.b32.xlu1 %v377_v5, %s1917_s5  ;;  %v410_v7 = vpack.c.bf16 %v377_v5, %v376_v4  ;;  %v1869_v4 = vld [vmem:[%s2431_s13] sm:$0xff]  }
 0x2bd   :  { %413 = vperm.xlu0 %1852, %v390_v6   ;;  %1710 = vmatprep.subr.bf16.mxu0 %v410_v7 }
 0x2be   :  { %1711 = vmatpush3.bf16.msra.mxu0 %v410_v7 }
 0x2bf   :  { %418 = vperm.xlu1 %1853, %v391_v8  }
 0x2c1   :  { %423 = vperm.xlu0 %1852, %v392_v10   ;;  %1713 = vmatmul.mubr.msk.bf16.vlgmr.msra.gmra.mrb[8].mxu0 %vm268_vm4, %v1860_v9 }
 0x2c2   :  { %1716 = vmatprep.mubr.msk.bf16.mxu0 %vm268_vm4, %v1861_v11 }
 0x2c3   :  { %428 = vperm.xlu1 %1853, %v393_v12  }
 0x2c9   :  { %1717 = vmatmul.mubr.msk.bf16.gmra.mrb[12].mxu0 %vm268_vm4, %v1862_v14 }
 0x2ca   :  { %1722 = vmatprep.mubr.msk.bf16.mxu0 %vm268_vm4, %v1863_v15 }
 0x32b   :  { %v549_v17 = vpop.permute.xlu0 %548 }
 0x32c   :  { %v552_v19 = vmul.f32 %v2118_v16, %v549_v17 }
 0x32d   :  { %v551_v18 = vpop.permute.xlu1 %550 }
 0x32e   :  { %v553_v20 = vmul.f32 %v2118_v16, %v551_v18 }
 0x330   :  { %v554_v21 = vpack.c.bf16 %v553_v20, %v552_v19 }
 0x332   :  { %1720 = vmatprep.subr.bf16.mxu0 %v554_v21 }
 0x333   :  { %1721 = vmatpush3.bf16.msra.mxu0 %v554_v21 }
 0x336   :  { %1723 = vmatmul.mubr.msk.bf16.vlgmr.msra.gmra.mrb[8].mxu0 %vm268_vm4, %v1864_v22 }
 0x33c   :  { %v414_v27 = vpop.permute.xlu0 %413 }
 0x33e   :  { %v419_v28 = vpop.permute.xlu1 %418 }
 0x340   :  { %v424_v29 = vpop.permute.xlu0 %423 }
 0x342   :  { %v429_v33 = vpop.permute.xlu1 %428 }
 0x39c   :  { %v2126_v23 = vpop.f32.mrb[12].mxu0 }
 0x39d   :  { %v2128_v24 = vpop.f32.mrb[13].mxu0 }
 0x39e   :  { %v2130_v25 = vpop.f32.mrb[14].mxu0 }
 0x39f   :  { %v2132_v26 = vpop.f32.mrb[15].mxu0 }
 0x409   :  { %v1724_v30 = vpop.f32.mrb[8].mxu0 }
 0x40a   :  { %v1806_v31 = vadd.f32 %v1724_v30, %v424_v29  ;;  %v605_v32 = vpop.f32.mrb[9].mxu0 }
 0x40b   :  { %v1807_v34 = vadd.f32 %v605_v32, %v414_v27  ;;  %v1725_v35 = vpop.f32.mrb[10].mxu0 }
 0x40c   :  { %v1808_v36 = vadd.f32 %v1725_v35, %v429_v33  ;;  %v608_v37 = vpop.f32.mrb[11].mxu0  ;;  %v626_v41 = vmax.f32 %v1806_v31, 0.0 }
 0x40d   :  { %v624_v38 = vmax.f32 %v1807_v34, 0.0  ;;  %v1809_v39 = vadd.f32 %v608_v37, %v419_v28 }
 0x40e   :  { %v627_v42 = vmax.f32 %v1808_v36, 0.0 }
 0x40f   :  { %v625_v43 = vmax.f32 %v1809_v39, 0.0  ;;  %630 = vrot.lane.b32.xlu0 %v624_v38, %s1917_s5  ;;  %v833_v39 = vld [vmem:[%s2433_s15 + $0x10] sm:$0xff] }
 0x410   :  { %v629_v44 = vpack.c.bf16 %v627_v42, %v626_v41 }
 0x411   :  { %v628_v45 = vpack.c.bf16 %v625_v43, %v624_v38  ;;  %632 = vrot.lane.b32.xlu1 %v625_v43, %s1917_s5  ;;  %v836_v43 = vld [vmem:[%s2433_s15 + $0x28] sm:$0xff] }
 0x413   :  { %634 = vrot.lane.b32.xlu0 %v626_v41, %s1917_s5  ;;  %v834_v41 = vld [vmem:[%s2433_s15 + $0x18] sm:$0xff] }
 0x415   :  { %636 = vrot.lane.b32.xlu1 %v627_v42, %s1917_s5  ;;  %v835_v42 = vld [vmem:[%s2433_s15 + $0x20] sm:$0xff] }
 0x417   :  { %777 = vperm.xlu0 %1852, %v406_v46   ;;  %v1873_v46 = vld [vmem:[%s2431_s13 + $0x20] sm:$0xff]  }
 0x419   :  { %782 = vperm.xlu1 %1853, %v407_v47   ;;  %v838_v47 = vld [vmem:[%s2433_s15 + $0x38] sm:$0xff] }
 0x41b   :  { %433 = vperm.xlu0 %1852, %v394_v48   ;;  %v1874_v48 = vld [vmem:[%s2431_s13 + $0x28] sm:$0xff]  }
 0x41d   :  { %438 = vperm.xlu1 %1853, %v395_v49   ;;  %v1875_v49 = vld [vmem:[%s2431_s13 + $0x30] sm:$0xff]  }
 0x41f   :  { %787 = vperm.xlu0 %1852, %v408_v50   ;;  %v1876_v50 = vld [vmem:[%s2431_s13 + $0x38] sm:$0xff]  }
 0x421   :  { %792 = vperm.xlu1 %1853, %v409_v51   ;;  %v1877_v51 = vld [vmem:[%s2432_s14] sm:$0xff]  }
 0x423   :  { %443 = vperm.xlu0 %1852, %v396_v52   ;;  %v2252_v52 = vsel %vm84_vm7, 1.0, %v1914_v3  ;;  %v1878_v3 = vld [vmem:[%s2432_s14 + $0x8] sm:$0xff]  }
 0x425   :  { %448 = vperm.xlu1 %1853, %v397_v53  }
 0x481   :  { %v631_v54 = vpop.permute.xlu0 %630 }
 0x482   :  { %v638_v56 = vmul.f32 %v2118_v16, %v631_v54 }
 0x483   :  { %v633_v55 = vpop.permute.xlu1 %632 }
 0x484   :  { %v639_v57 = vmul.f32 %v2118_v16, %v633_v55 }
 0x485   :  { %v635_v58 = vpop.permute.xlu0 %634 }
 0x486   :  { %v642_v59 = vpack.c.bf16 %v639_v57, %v638_v56  ;;  %v640_v61 = vmul.f32 %v2118_v16, %v635_v58 }
 0x487   :  { %v637_v60 = vpop.permute.xlu1 %636 }
 0x488   :  { %v641_v62 = vmul.f32 %v2118_v16, %v637_v60  ;;  %1726 = vmatprep.subr.bf16.mxu1 %v642_v59 }
 0x489   :  { %1727 = vmatpush3.bf16.msra.mxu1 %v642_v59 }
 0x48a   :  { %v643_v63 = vpack.c.bf16 %v641_v62, %v640_v61 }
 0x48c   :  { %1728 = vmatprep.subr.bf16.mxu1 %v643_v63 }
 0x48d   :  { %1729 = vmatpush3.bf16.msra.mxu1 %v643_v63  ;;  %v1880_v63 = vld [vmem:[%s2432_s14 + $0x18] sm:$0xff]  }
 0x48e   :  { %1734 = vmatprep.subr.bf16.mxu1 %v628_v45 }
 0x490   :  { %1731 = vmatmul.mubr.msk.bf16.vlgmr.msra.gmra.mrb[8].mxu1 %vm654_vm6, %v1866_v0 }
 0x491   :  { %1735 = vmatpush3.bf16.msra.mxu1 %v628_v45  ;;  %1738 = vmatprep.mubr.msk.bf16.mxu1 %vm654_vm6, %v1867_v1  ;;  %v837_v45 = vld [vmem:[%s2433_s15 + $0x30] sm:$0xff] }
 0x492   :  { %1736 = vmatprep.subr.bf16.mxu1 %v629_v44 }
 0x495   :  { %1737 = vmatpush3.bf16.msra.mxu1 %v629_v44  ;;  %v1872_v44 = vld [vmem:[%s2431_s13 + $0x18] sm:$0xff]  }
 0x496   :  { %v778_v5 = vpop.permute.xlu0 %777 }
 0x498   :  { %v783_v6 = vpop.permute.xlu1 %782 }
 0x49a   :  { %v434_v7 = vpop.permute.xlu0 %433 }
 0x49b   :  { %v534_v27 = vadd.f32 %v2128_v24, %v434_v7  ;;  %v831_v24 = vld [vmem:[%s2433_s15] sm:$0xff] }
 0x49c   :  { %1739 = vmatmul.mubr.msk.bf16.vlgmr.msra.gmra.mrb[8].mxu1 %vm654_vm6, %v1868_v2  ;;  %v439_v8 = vpop.permute.xlu1 %438 }
 0x49d   :  { %1746 = vmatprep.mubr.msk.bf16.mxu1 %vm654_vm6, %v1869_v4  ;;  %v537_v33 = vadd.f32 %v2132_v26, %v439_v8  ;;  %v1870_v26 = vld [vmem:[%s2431_s13 + $0x8] sm:$0xff]  }
 0x49e   :  { %v788_v9 = vpop.permute.xlu0 %787 }
 0x4a0   :  { %v793_v10 = vpop.permute.xlu1 %792 }
 0x4a2   :  { %v444_v11 = vpop.permute.xlu0 %443 }
 0x4a3   :  { %v542_v19 = vadd.f32 %v2126_v23, %v444_v11 }
 0x4a4   :  { %v449_v16 = vpop.permute.xlu1 %448 }
 0x4a5   :  { %v545_v30 = vadd.f32 %v2130_v25, %v449_v16  ;;  %v832_v25 = vld [vmem:[%s2433_s15 + $0x8] sm:$0xff] }
 0x56f   :  { %v1740_v12 = vpop.f32.mrb[8].mxu1 }
 0x570   :  { %v797_v14 = vadd.f32 %v1740_v12, %v788_v9  ;;  %v760_v15 = vpop.f32.mrb[9].mxu1 }
 0x571   :  { %v795_v17 = vadd.f32 %v778_v5, %v760_v15  ;;  %v1741_v18 = vpop.f32.mrb[10].mxu1 }
 0x572   :  { %v801_v20 = vmax.f32 %v797_v14, 0.0  ;;  %v798_v21 = vadd.f32 %v1741_v18, %v793_v10  ;;  %v763_v22 = vpop.f32.mrb[11].mxu1 }
 0x573   :  { %v799_v28 = vmax.f32 %v795_v17, 0.0  ;;  %v796_v29 = vadd.f32 %v783_v6, %v763_v22 }
 0x574   :  { %v805_v31 = vadd.f32 %v801_v20, %v542_v19  ;;  %v802_v32 = vmax.f32 %v798_v21, 0.0 }
 0x575   :  { %v803_v34 = vadd.f32 %v799_v28, %v534_v27  ;;  %v800_v35 = vmax.f32 %v796_v29, 0.0 }
 0x576   :  { %v806_v36 = vadd.f32 %v802_v32, %v545_v30 }
 0x577   :  { %v804_v37 = vadd.f32 %v800_v35, %v537_v33  ;;  %1114 = vrot.lane.b32.xlu0 %v803_v34, %s1918_s10 }
 0x578   :  { %v872_v23 = vpack.c.bf16 %v806_v36, %v805_v31 }
 0x579   :  { %1116 = vrot.lane.b32.xlu1 %v804_v37, %s1918_s10  ;;  %v871_v38 = vpack.c.bf16 %v804_v37, %v803_v34 }
 0x57b   :  { %1118 = vrot.lane.b32.xlu0 %v805_v31, %s1918_s10  ;;  %1742 = vmatprep.subr.bf16.mxu1 %v871_v38 }
 0x57c   :  { %1743 = vmatpush3.bf16.msra.mxu1 %v871_v38 }
 0x57d   :  { %1120 = vrot.lane.b32.xlu1 %v806_v36, %s1918_s10  ;;  %1744 = vmatprep.subr.bf16.mxu1 %v872_v23 }
 0x57f   :  { %875 = vperm.xlu0 %1852, %v831_v24  }
 0x580   :  { %1745 = vmatpush3.bf16.msra.mxu1 %v872_v23 }
 0x581   :  { %880 = vperm.xlu1 %1853, %v832_v25  }
 0x583   :  { %885 = vperm.xlu0 %1852, %v833_v39   ;;  %1747 = vmatmul.mubr.msk.bf16.vlgmr.msra.gmra.mrb[12].mxu1 %vm654_vm6, %v1870_v26 }
 0x584   :  { %1750 = vmatprep.mubr.msk.bf16.mxu1 %vm654_vm6, %v1871_v40 }
 0x585   :  { %890 = vperm.xlu1 %1853, %v834_v41   ;;  %v1881_v41 = vld [vmem:[%s2435_s17] sm:$0xff]  }
 0x586   :  { %1782 = vmatprep.mubr.msk.bf16.mxu0 %vm1293_vm8, %v1881_v41 }
 0x587   :  { %895 = vperm.xlu0 %1852, %v835_v42  }
 0x589   :  { %900 = vperm.xlu1 %1853, %v836_v43  }
 0x58b   :  { %905 = vperm.xlu0 %1852, %v837_v45   ;;  %1751 = vmatmul.mubr.msk.bf16.gmra.mrb[16].mxu1 %vm654_vm6, %v1872_v44 }
 0x58c   :  { %1754 = vmatprep.mubr.msk.bf16.mxu1 %vm654_vm6, %v1873_v46 }
 0x58d   :  { %910 = vperm.xlu1 %1853, %v838_v47   ;;  %v863_v47 = vld [vmem:[%s2436_s18] sm:$0xff] }
 0x593   :  { %1755 = vmatmul.mubr.msk.bf16.gmra.mrb[20].mxu1 %vm654_vm6, %v1874_v48  ;;  %v864_v48 = vld [vmem:[%s2436_s18 + $0x8] sm:$0xff] }
 0x594   :  { %1758 = vmatprep.mubr.msk.bf16.mxu1 %vm654_vm6, %v1875_v49  ;;  %v865_v49 = vld [vmem:[%s2436_s18 + $0x10] sm:$0xff] }
 0x59b   :  { %1759 = vmatmul.mubr.msk.bf16.gmra.mrb[24].mxu1 %vm654_vm6, %v1876_v50  ;;  %v866_v50 = vld [vmem:[%s2436_s18 + $0x18] sm:$0xff] }
 0x59c   :  { %1766 = vmatprep.mubr.msk.bf16.mxu1 %vm654_vm6, %v1877_v51  ;;  %v867_v51 = vld [vmem:[%s2436_s18 + $0x20] sm:$0xff] }
 0x5e9   :  { %v1115_v53 = vpop.permute.xlu0 %1114 }
 0x5ea   :  { %v1122_v55 = vmul.f32 %v2252_v52, %v1115_v53  ;;  %v868_v53 = vld [vmem:[%s2436_s18 + $0x28] sm:$0xff] }
 0x5eb   :  { %v1117_v54 = vpop.permute.xlu1 %1116 }
 0x5ec   :  { %v1123_v56 = vmul.f32 %v2252_v52, %v1117_v54  ;;  %v869_v54 = vld [vmem:[%s2436_s18 + $0x30] sm:$0xff] }
 0x5ed   :  { %v1119_v57 = vpop.permute.xlu0 %1118 }
 0x5ee   :  { %v1126_v58 = vpack.c.bf16 %v1123_v56, %v1122_v55  ;;  %v1124_v60 = vmul.f32 %v2252_v52, %v1119_v57  ;;  %v870_v55 = vld [vmem:[%s2436_s18 + $0x38] sm:$0xff]  ;;  %v839_v56 = vld [vmem:[%s2433_s15 + $0x40] sm:$0xff]  ;;  %v840_v57 = vld [vmem:[%s2433_s15 + $0x48] sm:$0xff] }
 0x5ef   :  { %v1121_v59 = vpop.permute.xlu1 %1120 }
 0x5f0   :  { %v1125_v61 = vmul.f32 %v2252_v52, %v1121_v59  ;;  %1762 = vmatprep.subr.bf16.mxu1 %v1126_v58  ;;  %v842_v59 = vld [vmem:[%s2433_s15 + $0x58] sm:$0xff] }
 0x5f1   :  { %1763 = vmatpush3.bf16.msra.mxu1 %v1126_v58  ;;  %v841_v58 = vld [vmem:[%s2433_s15 + $0x50] sm:$0xff] }
 0x5f2   :  { %v1127_v62 = vpack.c.bf16 %v1125_v61, %v1124_v60  ;;  %v843_v60 = vld [vmem:[%s2433_s15 + $0x60] sm:$0xff]  ;;  %v844_v61 = vld [vmem:[%s2433_s15 + $0x68] sm:$0xff] }
 0x5f4   :  { %1764 = vmatprep.subr.bf16.mxu1 %v1127_v62 }
 0x5f5   :  { %1765 = vmatpush3.bf16.msra.mxu1 %v1127_v62  ;;  %v845_v62 = vld [vmem:[%s2433_s15 + $0x70] sm:$0xff] }
 0x5f8   :  { %1767 = vmatmul.mubr.msk.bf16.vlgmr.msra.gmra.mrb[12].mxu1 %vm654_vm6, %v1878_v3  ;;  %v846_v3 = vld [vmem:[%s2433_s15 + $0x78] sm:$0xff] }
 0x5f9   :  { %1770 = vmatprep.mubr.msk.bf16.mxu1 %vm654_vm6, %v1879_v13 }
 0x5fe   :  { %v876_v9 = vpop.permute.xlu0 %875 }
 0x600   :  { %1771 = vmatmul.mubr.msk.bf16.gmra.mrb[16].mxu1 %vm654_vm6, %v1880_v63  ;;  %v881_v10 = vpop.permute.xlu1 %880 }
 0x602   :  { %v886_v11 = vpop.permute.xlu0 %885 }
 0x604   :  { %v891_v12 = vpop.permute.xlu1 %890 }
 0x606   :  { %v896_v17 = vpop.permute.xlu0 %895 }
 0x608   :  { %v901_v22 = vpop.permute.xlu1 %900 }
 0x60a   :  { %v906_v33 = vpop.permute.xlu0 %905 }
 0x60c   :  { %v911_v23 = vpop.permute.xlu1 %910 }
 0x666   :  { %v2270_v0 = vpop.f32.mrb[20].mxu1 }
 0x667   :  { %v2272_v1 = vpop.f32.mrb[21].mxu1 }
 0x668   :  { %v2274_v2 = vpop.f32.mrb[22].mxu1 }
 0x669   :  { %v2276_v4 = vpop.f32.mrb[23].mxu1 }
 0x66e   :  { %v2278_v5 = vpop.f32.mrb[24].mxu1 }
 0x66f   :  { %v2280_v6 = vpop.f32.mrb[25].mxu1 }
 0x670   :  { %v2282_v7 = vpop.f32.mrb[26].mxu1 }
 0x671   :  { %v2284_v8 = vpop.f32.mrb[27].mxu1 }
 0x6cb   :  { %v1768_v14 = vpop.f32.mrb[12].mxu1 }
 0x6cc   :  { %v1810_v15 = vadd.f32 %v1768_v14, %v886_v11  ;;  %v1194_v16 = vpop.f32.mrb[13].mxu1 }
 0x6cd   :  { %v1811_v18 = vadd.f32 %v1194_v16, %v876_v9  ;;  %v1769_v19 = vpop.f32.mrb[14].mxu1 }
 0x6ce   :  { %v1812_v20 = vadd.f32 %v1769_v19, %v891_v12  ;;  %v1197_v21 = vpop.f32.mrb[15].mxu1  ;;  %v1235_v29 = vmax.f32 %v1810_v15, 0.0 }
 0x6cf   :  { %v1233_v27 = vmax.f32 %v1811_v18, 0.0  ;;  %v1813_v28 = vadd.f32 %v1197_v21, %v881_v10 }
 0x6d0   :  { %v1236_v30 = vmax.f32 %v1812_v20, 0.0 }
 0x6d1   :  { %v1234_v31 = vmax.f32 %v1813_v28, 0.0  ;;  %1245 = vrot.lane.b32.xlu0 %v1233_v27, %s1918_s10 }
 0x6d2   :  { %v2287_v32 = vpack.c.bf16 %v1236_v30, %v1235_v29 }
 0x6d3   :  { %v2289_v34 = vpack.c.bf16 %v1234_v31, %v1233_v27  ;;  %1247 = vrot.lane.b32.xlu1 %v1234_v31, %s1918_s10  ;;  %v1772_v35 = vpop.f32.mrb[16].mxu1 }
 0x6d4   :  { %v1814_v36 = vadd.f32 %v1772_v35, %v906_v33  ;;  %v1210_v37 = vpop.f32.mrb[17].mxu1  ;;  %v1882_v33 = vld [vmem:[%s2435_s17 + $0x8] sm:$0xff]   ;;  %v1883_v35 = vld [vmem:[%s2435_s17 + $0x10] sm:$0xff]  }
 0x6d5   :  { %v1815_v38 = vadd.f32 %v1210_v37, %v896_v17  ;;  %1249 = vrot.lane.b32.xlu0 %v1235_v29, %s1918_s10  ;;  %v1773_v24 = vpop.f32.mrb[18].mxu1  ;;  %v1888_v37 = vld [vmem:[%s2434_s16 + $0x18] sm:$0xff]  }
 0x6d6   :  { %v1816_v25 = vadd.f32 %v1773_v24, %v911_v23  ;;  %v1213_v26 = vpop.f32.mrb[19].mxu1  ;;  %v1239_v42 = vmax.f32 %v1814_v36, 0.0  ;;  %v1885_v36 = vld [vmem:[%s2434_s16] sm:$0xff]  }
 0x6d7   :  { %v1237_v39 = vmax.f32 %v1815_v38, 0.0  ;;  %v1817_v40 = vadd.f32 %v1213_v26, %v901_v22  ;;  %1251 = vrot.lane.b32.xlu1 %v1236_v30, %s1918_s10 }
 0x6d8   :  { %v1240_v43 = vmax.f32 %v1816_v25, 0.0 }
 0x6d9   :  { %v1238_v44 = vmax.f32 %v1817_v40, 0.0  ;;  %1253 = vrot.lane.b32.xlu0 %v1237_v39, %s1918_s10 }
 0x6da   :  { %v2299_v45 = vpack.c.bf16 %v1240_v43, %v1239_v42 }
 0x6db   :  { %v2301_v46 = vpack.c.bf16 %v1238_v44, %v1237_v39  ;;  %1255 = vrot.lane.b32.xlu1 %v1238_v44, %s1918_s10 }
 0x6dd   :  { %1257 = vrot.lane.b32.xlu0 %v1239_v42, %s1918_s10 }
 0x6df   :  { %1259 = vrot.lane.b32.xlu1 %v1240_v43, %s1918_s10 }
 0x6e1   :  { %1470 = vperm.xlu0 %1852, %v863_v47  }
 0x6e3   :  { %1475 = vperm.xlu1 %1853, %v864_v48  }
 0x6e5   :  { %1480 = vperm.xlu0 %1852, %v865_v49  }
 0x6e7   :  { %1485 = vperm.xlu1 %1853, %v866_v50  }
 0x6e9   :  { %1490 = vperm.xlu0 %1852, %v867_v51  }
 0x6eb   :  { %1495 = vperm.xlu1 %1853, %v868_v53  }
 0x6ed   :  { %1500 = vperm.xlu0 %1852, %v869_v54  }
 0x6ef   :  { %1505 = vperm.xlu1 %1853, %v870_v55  }
 0x6f1   :  { %915 = vperm.xlu0 %1852, %v839_v56  }
 0x6f3   :  { %920 = vperm.xlu1 %1853, %v840_v57  }
 0x6f5   :  { %925 = vperm.xlu0 %1852, %v841_v58  }
 0x6f7   :  { %930 = vperm.xlu1 %1853, %v842_v59  }
 0x6f9   :  { %935 = vperm.xlu0 %1852, %v843_v60  }
 0x6fb   :  { %940 = vperm.xlu1 %1853, %v844_v61  }
 0x6fd   :  { %945 = vperm.xlu0 %1852, %v845_v62  }
 0x6ff   :  { %950 = vperm.xlu1 %1853, %v846_v3  }
 0x743   :  { %v1246_v13 = vpop.permute.xlu0 %1245 }
 0x744   :  { %v1261_v9 = vmul.f32 %v2252_v52, %v1246_v13 }
 0x745   :  { %v1248_v63 = vpop.permute.xlu1 %1247 }
 0x746   :  { %v1262_v10 = vmul.f32 %v2252_v52, %v1248_v63 }
 0x747   :  { %v1250_v11 = vpop.permute.xlu0 %1249 }
 0x748   :  { %v1269_v12 = vpack.c.bf16 %v1262_v10, %v1261_v9  ;;  %v1263_v15 = vmul.f32 %v2252_v52, %v1250_v11 }
 0x749   :  { %v1252_v14 = vpop.permute.xlu1 %1251 }
 0x74a   :  { %v1264_v16 = vmul.f32 %v2252_v52, %v1252_v14  ;;  %1774 = vmatprep.subr.bf16.mxu0 %v1269_v12 }
 0x74b   :  { %1775 = vmatpush3.bf16.msra.mxu0 %v1269_v12  ;;  %v1254_v17 = vpop.permute.xlu0 %1253 }
 0x74c   :  { %v1270_v18 = vpack.c.bf16 %v1264_v16, %v1263_v15  ;;  %v1265_v20 = vmul.f32 %v2252_v52, %v1254_v17 }
 0x74d   :  { %v1256_v19 = vpop.permute.xlu1 %1255 }
 0x74e   :  { %v1266_v21 = vmul.f32 %v2252_v52, %v1256_v19  ;;  %1776 = vmatprep.subr.bf16.mxu0 %v1270_v18 }
 0x74f   :  { %1777 = vmatpush3.bf16.msra.mxu0 %v1270_v18  ;;  %v1258_v22 = vpop.permute.xlu0 %1257 }
 0x750   :  { %v1271_v27 = vpack.c.bf16 %v1266_v21, %v1265_v20  ;;  %v1267_v29 = vmul.f32 %v2252_v52, %v1258_v22 }
 0x751   :  { %v1260_v28 = vpop.permute.xlu1 %1259 }
 0x752   :  { %v1268_v30 = vmul.f32 %v2252_v52, %v1260_v28  ;;  %1778 = vmatprep.subr.bf16.mxu0 %v1271_v27  ;;  %v1884_v52 = vld [vmem:[%s2435_s17 + $0x18] sm:$0xff]  }
 0x753   :  { %1779 = vmatpush3.bf16.msra.mxu0 %v1271_v27 }
 0x754   :  { %v1272_v31 = vpack.c.bf16 %v1268_v30, %v1267_v29 }
 0x756   :  { %1780 = vmatprep.subr.bf16.mxu0 %v1272_v31 }
 0x757   :  { %1781 = vmatpush3.bf16.msra.mxu0 %v1272_v31 }
 0x758   :  { %1790 = vmatprep.subr.bf16.mxu0 %v2289_v34 }
 0x75a   :  { %1783 = vmatmul.mubr.msk.bf16.vlgmr.msra.gmra.mrb[16].mxu0 %vm1293_vm8, %v1882_v33 }
 0x75b   :  { %1791 = vmatpush3.bf16.msra.mxu0 %v2289_v34  ;;  %1786 = vmatprep.mubr.msk.bf16.mxu0 %vm1293_vm8, %v1883_v35  ;;  %v1886_v34 = vld [vmem:[%s2434_s16 + $0x8] sm:$0xff]  }
 0x75c   :  { %1792 = vmatprep.subr.bf16.mxu0 %v2287_v32 }
 0x75f   :  { %1793 = vmatpush3.bf16.msra.mxu0 %v2287_v32  ;;  %v1887_v32 = vld [vmem:[%s2434_s16 + $0x10] sm:$0xff]   ;;  %s1919_s16 = smov [#allocation2]  }
 0x760   :  { %1794 = vmatprep.subr.bf16.mxu0 %v2301_v46  ;;  %v1471_v23 = vpop.permute.xlu0 %1470  ;;  %s1545_s3 = sshll.u32 %s1919_s16, 4  ;;  %s1546_s3 = int_to_ptr.vmem [resolvable:$true] %s1545_s3 }
 0x761   :  { %s1889_s13 = scalar_lea.vmem %s1546_s3, 1024  ;;  %p1894_p1 = scmp.lt.s32.totalorder %s1546_s3, %s1546_s3 }
 0x762   :  { %1787 = vmatmul.mubr.msk.bf16.gmra.mrb[20].mxu0 %vm1293_vm8, %v1884_v52  ;;  %v1476_v38 = vpop.permute.xlu1 %1475  ;;  %p1890_p0 = scmp.ne.s32.totalorder %s1546_s3, %s1889_s13  ;;  %p1895_p2 = scmp.lt.s32.totalorder %s1889_s13, %s1889_s13 }
 0x763   :  { %1795 = vmatpush3.bf16.msra.mxu0 %v2301_v46  ;;  %1798 = vmatprep.mubr.msk.bf16.mxu0 %vm1293_vm8, %v1885_v36 }
 0x764   :  { %1796 = vmatprep.subr.bf16.mxu0 %v2299_v45  ;;  %v1481_v24 = vpop.permute.xlu0 %1480  ;;  %p1896_p3 = por %p1895_p2, %p1894_p1 }
 0x766   :  { %v1486_v25 = vpop.permute.xlu1 %1485  ;;  %p1897_p4 = pnand %p1896_p3, %p1890_p0 }
 0x767   :  { %1797 = vmatpush3.bf16.msra.mxu0 %v2299_v45 }
 0x768   :  { %v1491_v26 = vpop.permute.xlu0 %1490 }
 0x76a   :  { %1799 = vmatmul.mubr.msk.bf16.vlgmr.msra.gmra.mrb[16].mxu0 %vm1293_vm8, %v1886_v34  ;;  %v1496_v39 = vpop.permute.xlu1 %1495 }
 0x76b   :  { %1802 = vmatprep.mubr.msk.bf16.mxu0 %vm1293_vm8, %v1887_v32 }
 0x76c   :  { %v1501_v40 = vpop.permute.xlu0 %1500 }
 0x76e   :  { %v1506_v41 = vpop.permute.xlu1 %1505 }
 0x770   :  { %v916_v42 = vpop.permute.xlu0 %915 }
 0x771   :  { %v1084_v57 = vadd.f32 %v2272_v1, %v916_v42 }
 0x772   :  { %1803 = vmatmul.mubr.msk.bf16.gmra.mrb[20].mxu0 %vm1293_vm8, %v1888_v37  ;;  %v921_v43 = vpop.permute.xlu1 %920 }
 0x773   :  { %v1087_v13 = vadd.f32 %v2276_v4, %v921_v43 }
 0x774   :  { %v926_v44 = vpop.permute.xlu0 %925 }
 0x775   :  { %v1092_v53 = vadd.f32 %v2270_v0, %v926_v44 }
 0x776   :  { %v931_v45 = vpop.permute.xlu1 %930 }
 0x777   :  { %v1095_v61 = vadd.f32 %v2274_v2, %v931_v45 }
 0x778   :  { %v936_v49 = vpop.permute.xlu0 %935 }
 0x779   :  { %v1100_v20 = vadd.f32 %v2280_v6, %v936_v49 }
 0x77a   :  { %v941_v58 = vpop.permute.xlu1 %940 }
 0x77b   :  { %v1103_v30 = vadd.f32 %v2284_v8, %v941_v58 }
 0x77c   :  { %v946_v11 = vpop.permute.xlu0 %945 }
 0x77d   :  { %v1108_v2 = vadd.f32 %v2278_v5, %v946_v11 }
 0x77e   :  { %v951_v15 = vpop.permute.xlu1 %950 }
 0x77f   :  { %v1111_v27 = vadd.f32 %v2282_v7, %v951_v15 }
 0x83d   :  { %v1800_v46 = vpop.f32.mrb[16].mxu0 }
 0x83e   :  { %v1510_v47 = vadd.f32 %v1800_v46, %v1481_v24  ;;  %v1437_v48 = vpop.f32.mrb[17].mxu0 }
 0x83f   :  { %v1508_v50 = vadd.f32 %v1471_v23, %v1437_v48  ;;  %v1801_v51 = vpop.f32.mrb[18].mxu0 }
 0x840   :  { %v1518_v54 = vmax.f32 %v1510_v47, 0.0  ;;  %v1511_v55 = vadd.f32 %v1801_v51, %v1486_v25  ;;  %v1440_v56 = vpop.f32.mrb[19].mxu0 }
 0x841   :  { %v1516_v59 = vmax.f32 %v1508_v50, 0.0  ;;  %v1509_v60 = vadd.f32 %v1476_v38, %v1440_v56 }
 0x842   :  { %v1526_v62 = vadd.f32 %v1518_v54, %v1092_v53  ;;  %v1519_v3 = vmax.f32 %v1511_v55, 0.0 }
 0x843   :  { %v1524_v63 = vadd.f32 %v1516_v59, %v1084_v57  ;;  %v1517_v9 = vmax.f32 %v1509_v60, 0.0 }
 0x844   :  { %1534 = vst [vmem:[#allocation2 + $0x10] sm:$0xff] %v1526_v62  ;;  %v1527_v10 = vadd.f32 %v1519_v3, %v1095_v61 }
 0x845   :  { %1532 = vst [vmem:[#allocation2] sm:$0xff] %v1524_v63  ;;  %v1525_v0 = vadd.f32 %v1517_v9, %v1087_v13  ;;  %v1804_v12 = vpop.f32.mrb[20].mxu0 }
 0x846   :  { %1535 = vst [vmem:[#allocation2 + $0x18] sm:$0xff] %v1527_v10  ;;  %v1514_v14 = vadd.f32 %v1804_v12, %v1501_v40  ;;  %v1453_v1 = vpop.f32.mrb[21].mxu0 }
 0x847   :  { %1533 = vst [vmem:[#allocation2 + $0x8] sm:$0xff] %v1525_v0  ;;  %v1512_v16 = vadd.f32 %v1491_v26, %v1453_v1  ;;  %v1805_v17 = vpop.f32.mrb[22].mxu0 }
 0x848   :  { %v1522_v18 = vmax.f32 %v1514_v14, 0.0  ;;  %v1515_v19 = vadd.f32 %v1805_v17, %v1506_v41  ;;  %v1456_v4 = vpop.f32.mrb[23].mxu0 }
 0x849   :  { %v1520_v21 = vmax.f32 %v1512_v16, 0.0  ;;  %v1513_v22 = vadd.f32 %v1496_v39, %v1456_v4 }
 0x84a   :  { %v1530_v28 = vadd.f32 %v1522_v18, %v1108_v2  ;;  %v1523_v29 = vmax.f32 %v1515_v19, 0.0 }
 0x84b   :  { %v1528_v31 = vadd.f32 %v1520_v21, %v1100_v20  ;;  %v1521_v33 = vmax.f32 %v1513_v22, 0.0 }
 0x84c   :  { %1538 = vst [vmem:[#allocation2 + $0x30] sm:$0xff] %v1530_v28  ;;  %v1531_v35 = vadd.f32 %v1523_v29, %v1111_v27 }
 0x84d   :  { %1536 = vst [vmem:[#allocation2 + $0x20] sm:$0xff] %v1528_v31  ;;  %v1529_v5 = vadd.f32 %v1521_v33, %v1103_v30 }
 0x84e   :  { %1539 = vst [vmem:[#allocation2 + $0x38] sm:$0xff] %v1531_v35 }
 0x84f   :  { %1537 = vst [vmem:[#allocation2 + $0x28] sm:$0xff] %v1529_v5 }
 0x850   :  { %1900 = shalt.err (!%p1897_p4)
}
 0x851   :  { %s1901_s28 = scalar_lea.hbm %s2437_s19, 1024 }
 0x852   :  { %p1902_p5 = scmp.ne.s32.totalorder %s2437_s19, %s1901_s28  ;;  %p1905_p6 = scmp.lt.u32.totalorder %s1901_s28, %s2437_s19 }
 0x854   :  { %p1907_p7 = pnand %p1905_p6, %p1902_p5 }
 0x856   :  { %1910 = shalt.err (!%p1907_p7)
}
 0x857   :  { %s1920_s6 = smov 128   ;;  %s1921_s9 = smov 8  }
 0x858   :  { %1551 = dma.vmem_to_hbm [thread:$0]  %s1546_s3, 1024, %s2437_s19, [#allocation3], %s1920_s6, %s1920_s6, %s1921_s9  }
 0x859   :  { %1911 = dma.done.wait [#allocation3], 1024  }
 0x85a   :  { %1912 = vsyncadd [#allocation3], 4294966272 }
 0x85b   :  { %1555 = vsyncpa [#allocation3], 1 }

</bundles_post_ra>
